<compile_context>
chip_gen: v7x
topology: tpu7x:2x2x1
jax: 0.10.0
libtpu: 0.0.40
codegen_flags: <defaults>
</compile_context>

<pallas_src>
import functools

import jax
import jax.numpy as jnp
from jax.experimental import pallas as pl
from jax.experimental.pallas import tpu as pltpu

_LANE = 128
_NSLOT = 8  # in-flight gather DMAs per token stream (bounds semaphore usage)


def _round_up(x, m):
    return (x + m - 1) // m * m


def _choose_batch_tile(batch, emb, lpad):
    """Rows per grid step: large MXU-friendly M tiles, bounded by a VMEM budget
    that leaves headroom on v7x (64 MiB physical / 32 MiB default scoped)."""
    tb = min(512, _round_up(batch, 8))
    budget = 16 << 20
    # f32 gather buffer + double-buffered f32 output + bf16 weight
    while tb > 8 and (2 * tb * emb * 4 + 2 * tb * lpad * 4 + emb * lpad * 2) > budget:
        tb = max(8, (tb // 2) // 8 * 8)
    return tb


def _tratz_kernel(total_rows, tb,
                  ids_ref, table_hbm, w_ref, b_ref, out_ref, gbuf, sems):
    # ids_ref:   (2*total_rows,) int32 in SMEM, token-major: [tok0 of all rows, tok1 ...]
    # table_hbm: (vocab, emb) f32, raw HBM ref (manual DMA gather)
    # w_ref:     (emb, 128) bf16  = 0.5 * W^T, zero-padded on the label axis
    # b_ref:     (1, 128)  f32    = bias, zero-padded
    # out_ref:   (tb, 128) f32
    # gbuf:      (2, tb, emb) f32 VMEM gather buffer (token-major layout)
    # sems:      (2, _NSLOT) DMA semaphores (ring of in-flight row copies)
    base = pl.program_id(0) * tb

    def issue(t, r):
        tok = ids_ref[t * total_rows + base + r]
        pltpu.make_async_copy(table_hbm.at[tok], gbuf.at[t, r],
                              sems.at[t, r % _NSLOT]).start()

    def wait(t, r):
        pltpu.make_async_copy(table_hbm.at[0], gbuf.at[t, r],
                              sems.at[t, r % _NSLOT]).wait()

    nprime = min(_NSLOT, tb)

    # Prime the DMA ring.
    @pl.loop(0, nprime)
    def _(r):
        issue(0, r)
        issue(1, r)

    # Steady state: retire the oldest row in a slot, then reuse the slot.
    if tb > nprime:
        @pl.loop(nprime, tb)
        def _(r):
            wait(0, r - nprime)
            wait(1, r - nprime)
            issue(0, r)
            issue(1, r)

    # Drain the last nprime rows.
    @pl.loop(tb - nprime, tb)
    def _(r):
        wait(0, r)
        wait(1, r)

    # MWE composition = mean over the 2 tokens (the 0.5 is folded into w_ref).
    x = (gbuf[0] + gbuf[1]).astype(jnp.bfloat16)                     # (tb, emb)
    y = jnp.dot(x, w_ref[...], preferred_element_type=jnp.float32)   # (tb, 128) on MXU
    out_ref[...] = y + b_ref[...]


def prepare_tratz_params(weight, bias):
    """One-time parameter prep. weight: (num_labels, emb) torch layout, bias: (num_labels,).
    Returns 0.5*W^T zero-padded to (emb, 128) bf16 and bias padded to (1, 128) f32."""
    num_labels, emb = weight.shape
    lpad = _round_up(max(num_labels, 1), _LANE)
    w_t = 0.5 * weight.T.astype(jnp.float32)                                    # (emb, L)
    w_p = jnp.zeros((emb, lpad), jnp.float32).at[:, :num_labels].set(w_t)
    b_p = jnp.zeros((1, lpad), jnp.float32).at[0, :num_labels].set(bias.astype(jnp.float32))
    return w_p.astype(jnp.bfloat16), b_p


def tratz_evaluation_forward(input_data, embedding_table, w_prepped, b_prepped, num_labels):
    """
    input_data:      (batch, 2) int token ids
    embedding_table: (vocab, emb) f32
    w_prepped:       (emb, 128) bf16   from prepare_tratz_params
    b_prepped:       (1, 128)  f32     from prepare_tratz_params
    returns:         (batch, num_labels) f32
    """
    batch = input_data.shape[0]
    emb = embedding_table.shape[1]
    lpad = w_prepped.shape[1]

    tb = _choose_batch_tile(batch, emb, lpad)
    padded_batch = _round_up(batch, tb)

    ids = input_data.astype(jnp.int32)
    if padded_batch != batch:
        ids = jnp.concatenate(
            [ids, jnp.zeros((padded_batch - batch, 2), jnp.int32)], axis=0)
    # Token-major flat layout matching the (2, tb, emb) gather buffer.
    ids_flat = ids.T.reshape(-1)                                     # (2 * padded_batch,)

    grid_spec = pltpu.PrefetchScalarGridSpec(
        num_scalar_prefetch=1,
        grid=(padded_batch // tb,),
        in_specs=[
            pl.BlockSpec(memory_space=pl.ANY),                       # embedding table (HBM)
            pl.BlockSpec((emb, lpad), lambda b, ids: (0, 0)),        # weight, VMEM-resident
            pl.BlockSpec((1, lpad), lambda b, ids: (0, 0)),          # bias,   VMEM-resident
        ],
        out_specs=pl.BlockSpec((tb, lpad), lambda b, ids: (b, 0)),
        scratch_shapes=[
            pltpu.VMEM((2, tb, emb), jnp.float32),
            pltpu.SemaphoreType.DMA((2, _NSLOT)),
        ],
    )

    kernel = functools.partial(_tratz_kernel, padded_batch, tb)
    out_padded = pl.pallas_call(
        kernel,
        out_shape=jax.ShapeDtypeStruct((padded_batch, lpad), jnp.float32),
        grid_spec=grid_spec,
        compiler_params=pltpu.CompilerParams(
            dimension_semantics=("parallel",)),
    )(ids_flat, embedding_table.astype(jnp.float32), w_prepped, b_prepped)

    return out_padded[:batch, :num_labels]


if __name__ == "__main__":
    # Small, deterministic synthetic setup (no checkpoint loading).
    batch = 8
    mwe_length = 2
    vocab_size = 64
    embedding_size = 128        # embedding_function.embedding_size
    num_labels = 16             # len(label_vocab)

    key = jax.random.PRNGKey(0)
    k_emb, k_w, k_b, k_ids = jax.random.split(key, 4)

    embedding_table = jax.random.normal(k_emb, (vocab_size, embedding_size), jnp.float32)
    # nn.Linear(in=embedding_size, out=num_labels): torch layout (out, in).
    weight = jax.random.normal(k_w, (num_labels, embedding_size), jnp.float32) * 0.05
    bias = jax.random.normal(k_b, (num_labels,), jnp.float32) * 0.01

    input_data = jax.random.randint(k_ids, (batch, mwe_length), 0, vocab_size, jnp.int32)

    w_prepped, b_prepped = prepare_tratz_params(weight, bias)
    out = tratz_evaluation_forward(input_data, embedding_table, w_prepped, b_prepped, num_labels)
    out = jax.block_until_ready(out)

    # Pure-JAX f32 reference (matches the PyTorch module).
    ref_emb = jnp.take(embedding_table, input_data, axis=0)          # (batch, 2, emb)
    ref_x = ref_emb.mean(axis=1)                                     # mean-pool MWE composition
    ref = ref_x @ weight.T + bias

    assert out.shape == (batch, num_labels)
    # bf16 MXU path -> loosened tolerance vs the f32 reference.
    assert jnp.allclose(out, ref, atol=2e-2, rtol=2e-2), float(jnp.max(jnp.abs(out - ref)))

    print("KERNEL_OK")
</pallas_src>

<mosaic_0001>
module attributes {stable_mosaic.version = 11 : i64} {
  func.func @_tratz_kernel(%arg0: i32, %arg1: memref<16xi32, #tpu.memory_space<smem>>, %arg2: memref<64x128xf32, #tpu.memory_space<any>>, %arg3: memref<128x128xbf16, #tpu.memory_space<vmem>>, %arg4: memref<1x128xf32, #tpu.memory_space<vmem>>, %arg5: memref<8x128xf32, #tpu.memory_space<vmem>>, %arg6: memref<2x8x128xf32, #tpu.memory_space<vmem>>, %arg7: memref<2x8x!tpu.dma_semaphore, #tpu.memory_space<semaphore_mem>>) attributes {dimension_semantics = [#tpu.dimension_semantics<parallel>], iteration_bounds = array<i64: 1>, scalar_prefetch = 1 : i64, scratch_operands = 2 : i64, tpu.core_type = #tpu.core_type<tc>, window_params = [{}, {pipeline_mode = #tpu.pipeline_mode<synchronous>, transform_indices = @transform_1, window_bounds = array<i64: 128, 128>}, {pipeline_mode = #tpu.pipeline_mode<synchronous>, transform_indices = @transform_2, window_bounds = array<i64: 1, 128>}, {transform_indices = @transform_3, window_bounds = array<i64: 8, 128>}]} {
    %c8_i32 = arith.constant 8 : i32
    %0 = arith.muli %arg0, %c8_i32 : i32
    %c0_i32 = arith.constant 0 : i32
    %c8_i32_0 = arith.constant 8 : i32
    %1 = arith.addi %c0_i32, %c8_i32_0 : i32
    %c1_i32 = arith.constant 1 : i32
    scf.for %arg8 = %c0_i32 to %1 step %c1_i32  : i32 {
      %c1_i32_16 = arith.constant 1 : i32
      %15 = arith.muli %arg8, %c1_i32_16 : i32
      %c0_i32_17 = arith.constant 0 : i32
      %16 = arith.addi %c0_i32_17, %15 : i32
      %c0_i32_18 = arith.constant 0 : i32
      %17 = arith.addi %c0_i32_18, %0 : i32
      %18 = arith.addi %17, %16 : i32
      %19 = arith.index_cast %18 : i32 to index
      %20 = memref.load %arg1[%19] : memref<16xi32, #tpu.memory_space<smem>>
      %c8_i32_19 = arith.constant 8 : i32
      %c0_i32_20 = arith.constant 0 : i32
      %21 = arith.cmpi eq, %c8_i32_19, %c0_i32_20 : i32
      %c1_i32_21 = arith.constant 1 : i32
      %22 = arith.select %21, %c1_i32_21, %c8_i32_19 : i32
      %23 = arith.remsi %16, %22 : i32
      %c0_i32_22 = arith.constant 0 : i32
      %24 = arith.cmpi ne, %23, %c0_i32_22 : i32
      %c0_i32_23 = arith.constant 0 : i32
      %25 = arith.cmpi slt, %23, %c0_i32_23 : i32
      %c0_i32_24 = arith.constant 0 : i32
      %26 = arith.cmpi slt, %22, %c0_i32_24 : i32
      %27 = arith.xori %25, %26 : i1
      %28 = arith.andi %27, %24 : i1
      %29 = arith.addi %23, %22 : i32
      %30 = arith.select %28, %29, %23 : i32
      %c0_i32_25 = arith.constant 0 : i32
      %c0_i32_26 = arith.constant 0 : i32
      %c0_i32_27 = arith.constant 0 : i32
      %31 = tpu.memref_slice %arg2[%20, %c0_i32_27] : memref<64x128xf32, #tpu.memory_space<any>> -> memref<1x128xf32, #tpu.memory_space<any>>
      %32 = tpu.memref_squeeze %31 : memref<1x128xf32, #tpu.memory_space<any>> -> memref<128xf32, #tpu.memory_space<any>>
      %c0_i32_28 = arith.constant 0 : i32
      %33 = tpu.memref_slice %arg6[%c0_i32_25, %16, %c0_i32_28] : memref<2x8x128xf32, #tpu.memory_space<vmem>> -> memref<1x1x128xf32, #tpu.memory_space<vmem>>
      %34 = tpu.memref_squeeze %33 : memref<1x1x128xf32, #tpu.memory_space<vmem>> -> memref<128xf32, #tpu.memory_space<vmem>>
      %35 = tpu.memref_slice %arg7[%c0_i32_26, %30] : memref<2x8x!tpu.dma_semaphore, #tpu.memory_space<semaphore_mem>> -> memref<1x1x!tpu.dma_semaphore, #tpu.memory_space<semaphore_mem>>
      %36 = tpu.memref_squeeze %35 : memref<1x1x!tpu.dma_semaphore, #tpu.memory_space<semaphore_mem>> -> memref<!tpu.dma_semaphore, #tpu.memory_space<semaphore_mem>>
      tpu.enqueue_dma source(%32 : memref<128xf32, #tpu.memory_space<any>>) target(%34 : memref<128xf32, #tpu.memory_space<vmem>>) target_semaphore(%36 : memref<!tpu.dma_semaphore, #tpu.memory_space<semaphore_mem>>)
      %c8_i32_29 = arith.constant 8 : i32
      %37 = arith.addi %c8_i32_29, %0 : i32
      %38 = arith.addi %37, %16 : i32
      %39 = arith.index_cast %38 : i32 to index
      %40 = memref.load %arg1[%39] : memref<16xi32, #tpu.memory_space<smem>>
      %c8_i32_30 = arith.constant 8 : i32
      %c0_i32_31 = arith.constant 0 : i32
      %41 = arith.cmpi eq, %c8_i32_30, %c0_i32_31 : i32
      %c1_i32_32 = arith.constant 1 : i32
      %42 = arith.select %41, %c1_i32_32, %c8_i32_30 : i32
      %43 = arith.remsi %16, %42 : i32
      %c0_i32_33 = arith.constant 0 : i32
      %44 = arith.cmpi ne, %43, %c0_i32_33 : i32
      %c0_i32_34 = arith.constant 0 : i32
      %45 = arith.cmpi slt, %43, %c0_i32_34 : i32
      %c0_i32_35 = arith.constant 0 : i32
      %46 = arith.cmpi slt, %42, %c0_i32_35 : i32
      %47 = arith.xori %45, %46 : i1
      %48 = arith.andi %47, %44 : i1
      %49 = arith.addi %43, %42 : i32
      %50 = arith.select %48, %49, %43 : i32
      %c1_i32_36 = arith.constant 1 : i32
      %c1_i32_37 = arith.constant 1 : i32
      %c0_i32_38 = arith.constant 0 : i32
      %51 = tpu.memref_slice %arg2[%40, %c0_i32_38] : memref<64x128xf32, #tpu.memory_space<any>> -> memref<1x128xf32, #tpu.memory_space<any>>
      %52 = tpu.memref_squeeze %51 : memref<1x128xf32, #tpu.memory_space<any>> -> memref<128xf32, #tpu.memory_space<any>>
      %c0_i32_39 = arith.constant 0 : i32
      %53 = tpu.memref_slice %arg6[%c1_i32_36, %16, %c0_i32_39] : memref<2x8x128xf32, #tpu.memory_space<vmem>> -> memref<1x1x128xf32, #tpu.memory_space<vmem>>
      %54 = tpu.memref_squeeze %53 : memref<1x1x128xf32, #tpu.memory_space<vmem>> -> memref<128xf32, #tpu.memory_space<vmem>>
      %55 = tpu.memref_slice %arg7[%c1_i32_37, %50] : memref<2x8x!tpu.dma_semaphore, #tpu.memory_space<semaphore_mem>> -> memref<1x1x!tpu.dma_semaphore, #tpu.memory_space<semaphore_mem>>
      %56 = tpu.memref_squeeze %55 : memref<1x1x!tpu.dma_semaphore, #tpu.memory_space<semaphore_mem>> -> memref<!tpu.dma_semaphore, #tpu.memory_space<semaphore_mem>>
      tpu.enqueue_dma source(%52 : memref<128xf32, #tpu.memory_space<any>>) target(%54 : memref<128xf32, #tpu.memory_space<vmem>>) target_semaphore(%56 : memref<!tpu.dma_semaphore, #tpu.memory_space<semaphore_mem>>)
    }
    %c8_i32_1 = arith.constant 8 : i32
    %c0_i32_2 = arith.constant 0 : i32
    %c8_i32_3 = arith.constant 8 : i32
    %2 = arith.addi %c0_i32_2, %c8_i32_3 : i32
    %c1_i32_4 = arith.constant 1 : i32
    scf.for %arg8 = %c0_i32_2 to %2 step %c1_i32_4  : i32 {
      %c1_i32_16 = arith.constant 1 : i32
      %15 = arith.muli %arg8, %c1_i32_16 : i32
      %c0_i32_17 = arith.constant 0 : i32
      %16 = arith.addi %c0_i32_17, %15 : i32
      %c8_i32_18 = arith.constant 8 : i32
      %c0_i32_19 = arith.constant 0 : i32
      %17 = arith.cmpi eq, %c8_i32_18, %c0_i32_19 : i32
      %c1_i32_20 = arith.constant 1 : i32
      %18 = arith.select %17, %c1_i32_20, %c8_i32_18 : i32
      %19 = arith.remsi %16, %18 : i32
      %c0_i32_21 = arith.constant 0 : i32
      %20 = arith.cmpi ne, %19, %c0_i32_21 : i32
      %c0_i32_22 = arith.constant 0 : i32
      %21 = arith.cmpi slt, %19, %c0_i32_22 : i32
      %c0_i32_23 = arith.constant 0 : i32
      %22 = arith.cmpi slt, %18, %c0_i32_23 : i32
      %23 = arith.xori %21, %22 : i1
      %24 = arith.andi %23, %20 : i1
      %25 = arith.addi %19, %18 : i32
      %26 = arith.select %24, %25, %19 : i32
      %c0_i32_24 = arith.constant 0 : i32
      %c0_i32_25 = arith.constant 0 : i32
      %c0_i32_26 = arith.constant 0 : i32
      %c0_i32_27 = arith.constant 0 : i32
      %27 = tpu.memref_slice %arg2[%c0_i32_24, %c0_i32_27] : memref<64x128xf32, #tpu.memory_space<any>> -> memref<1x128xf32, #tpu.memory_space<any>>
      %28 = tpu.memref_squeeze %27 : memref<1x128xf32, #tpu.memory_space<any>> -> memref<128xf32, #tpu.memory_space<any>>
      %c0_i32_28 = arith.constant 0 : i32
      %29 = tpu.memref_slice %arg6[%c0_i32_25, %16, %c0_i32_28] : memref<2x8x128xf32, #tpu.memory_space<vmem>> -> memref<1x1x128xf32, #tpu.memory_space<vmem>>
      %30 = tpu.memref_squeeze %29 : memref<1x1x128xf32, #tpu.memory_space<vmem>> -> memref<128xf32, #tpu.memory_space<vmem>>
      %31 = tpu.memref_slice %arg7[%c0_i32_26, %26] : memref<2x8x!tpu.dma_semaphore, #tpu.memory_space<semaphore_mem>> -> memref<1x1x!tpu.dma_semaphore, #tpu.memory_space<semaphore_mem>>
      %32 = tpu.memref_squeeze %31 : memref<1x1x!tpu.dma_semaphore, #tpu.memory_space<semaphore_mem>> -> memref<!tpu.dma_semaphore, #tpu.memory_space<semaphore_mem>>
      tpu.wait_dma2 semaphore(%32 : memref<!tpu.dma_semaphore, #tpu.memory_space<semaphore_mem>>) src(%28 : memref<128xf32, #tpu.memory_space<any>>) dst(%30 : memref<128xf32, #tpu.memory_space<vmem>>)
      %c8_i32_29 = arith.constant 8 : i32
      %c0_i32_30 = arith.constant 0 : i32
      %33 = arith.cmpi eq, %c8_i32_29, %c0_i32_30 : i32
      %c1_i32_31 = arith.constant 1 : i32
      %34 = arith.select %33, %c1_i32_31, %c8_i32_29 : i32
      %35 = arith.remsi %16, %34 : i32
      %c0_i32_32 = arith.constant 0 : i32
      %36 = arith.cmpi ne, %35, %c0_i32_32 : i32
      %c0_i32_33 = arith.constant 0 : i32
      %37 = arith.cmpi slt, %35, %c0_i32_33 : i32
      %c0_i32_34 = arith.constant 0 : i32
      %38 = arith.cmpi slt, %34, %c0_i32_34 : i32
      %39 = arith.xori %37, %38 : i1
      %40 = arith.andi %39, %36 : i1
      %41 = arith.addi %35, %34 : i32
      %42 = arith.select %40, %41, %35 : i32
      %c0_i32_35 = arith.constant 0 : i32
      %c1_i32_36 = arith.constant 1 : i32
      %c1_i32_37 = arith.constant 1 : i32
      %c0_i32_38 = arith.constant 0 : i32
      %43 = tpu.memref_slice %arg2[%c0_i32_35, %c0_i32_38] : memref<64x128xf32, #tpu.memory_space<any>> -> memref<1x128xf32, #tpu.memory_space<any>>
      %44 = tpu.memref_squeeze %43 : memref<1x128xf32, #tpu.memory_space<any>> -> memref<128xf32, #tpu.memory_space<any>>
      %c0_i32_39 = arith.constant 0 : i32
      %45 = tpu.memref_slice %arg6[%c1_i32_36, %16, %c0_i32_39] : memref<2x8x128xf32, #tpu.memory_space<vmem>> -> memref<1x1x128xf32, #tpu.memory_space<vmem>>
      %46 = tpu.memref_squeeze %45 : memref<1x1x128xf32, #tpu.memory_space<vmem>> -> memref<128xf32, #tpu.memory_space<vmem>>
      %47 = tpu.memref_slice %arg7[%c1_i32_37, %42] : memref<2x8x!tpu.dma_semaphore, #tpu.memory_space<semaphore_mem>> -> memref<1x1x!tpu.dma_semaphore, #tpu.memory_space<semaphore_mem>>
      %48 = tpu.memref_squeeze %47 : memref<1x1x!tpu.dma_semaphore, #tpu.memory_space<semaphore_mem>> -> memref<!tpu.dma_semaphore, #tpu.memory_space<semaphore_mem>>
      tpu.wait_dma2 semaphore(%48 : memref<!tpu.dma_semaphore, #tpu.memory_space<semaphore_mem>>) src(%44 : memref<128xf32, #tpu.memory_space<any>>) dst(%46 : memref<128xf32, #tpu.memory_space<vmem>>)
    }
    %c8_i32_5 = arith.constant 8 : i32
    %c0 = arith.constant 0 : index
    %c0_6 = arith.constant 0 : index
    %c0_7 = arith.constant 0 : index
    %3 = vector.load %arg6[%c0, %c0_6, %c0_7] : memref<2x8x128xf32, #tpu.memory_space<vmem>>, vector<1x8x128xf32>
    %4 = vector.shape_cast %3 : vector<1x8x128xf32> to vector<8x128xf32>
    %c1 = arith.constant 1 : index
    %c0_8 = arith.constant 0 : index
    %c0_9 = arith.constant 0 : index
    %5 = vector.load %arg6[%c1, %c0_8, %c0_9] : memref<2x8x128xf32, #tpu.memory_space<vmem>>, vector<1x8x128xf32>
    %6 = vector.shape_cast %5 : vector<1x8x128xf32> to vector<8x128xf32>
    %7 = arith.addf %4, %6 : vector<8x128xf32>
    %8 = arith.truncf %7 : vector<8x128xf32> to vector<8x128xbf16>
    %c0_10 = arith.constant 0 : index
    %c0_11 = arith.constant 0 : index
    %9 = vector.load %arg3[%c0_10, %c0_11] : memref<128x128xbf16, #tpu.memory_space<vmem>>, vector<128x128xbf16>
    %cst = arith.constant dense<0.000000e+00> : vector<8x128xf32>
    %10 = tpu.matmul %8, %9, %cst {dimension_numbers = #tpu.dot_dimension_numbers<[1], [0], [0], [1], [0, 0, 1, 1], [], []>} : vector<8x128xbf16>, vector<128x128xbf16>, vector<8x128xf32> -> vector<8x128xf32>
    %c0_12 = arith.constant 0 : index
    %c0_13 = arith.constant 0 : index
    %11 = vector.load %arg4[%c0_12, %c0_13] : memref<1x128xf32, #tpu.memory_space<vmem>>, vector<1x128xf32>
    %12 = vector.broadcast %11 : vector<1x128xf32> to vector<8x128xf32>
    %13 = arith.addf %10, %12 : vector<8x128xf32>
    %c0_14 = arith.constant 0 : index
    %c0_15 = arith.constant 0 : index
    %14 = vector.load %arg5[%c0_14, %c0_15] : memref<8x128xf32, #tpu.memory_space<vmem>>, vector<8x128xf32>
    tpu.vector_store %arg5[%c0_14, %c0_15], %13 {strides = array<i32>} : memref<8x128xf32, #tpu.memory_space<vmem>>, vector<8x128xf32>,
    return
  }
  func.func @transform_1(%arg0: i32, %arg1: memref<16xi32, #tpu.memory_space<smem>>) -> (i32, i32) {
    %c0_i32 = arith.constant 0 : i32
    %c0_i32_0 = arith.constant 0 : i32
    %c0_i32_1 = arith.constant 0 : i32
    return %c0_i32, %c0_i32_0 : i32, i32
  }
  func.func @transform_2(%arg0: i32, %arg1: memref<16xi32, #tpu.memory_space<smem>>) -> (i32, i32) {
    %c0_i32 = arith.constant 0 : i32
    %c0_i32_0 = arith.constant 0 : i32
    %c0_i32_1 = arith.constant 0 : i32
    return %c0_i32, %c0_i32_0 : i32, i32
  }
  func.func @transform_3(%arg0: i32, %arg1: memref<16xi32, #tpu.memory_space<smem>>) -> (i32, i32) {
    %c0_i32 = arith.constant 0 : i32
    %c0_i32_0 = arith.constant 0 : i32
    return %arg0, %c0_i32 : i32, i32
  }
}

</mosaic_0001>

<bundles_post_ra>
// kernel: tpu_custom_call.1
= control target key start
LH: loop header
LB: loop body
LE: loop exit
PB: predicated region body
PF: predicated region fallthrough
CT: control target
= control target key end

     0   :  { %s717_s0 = inlined_call_operand.hbm [shape: s32[16], index: 0, kind: input, shape index: {}]   ;;  %s718_s1 = inlined_call_operand.hbm [shape: f32[64,128], index: 1, kind: input, shape index: {}]   ;;  %s719_s2 = inlined_call_operand.hbm [shape: bf16[128,128], index: 2, kind: input, shape index: {}]   ;;  %s720_s3 = inlined_call_operand.vmem [shape: f32[1,128], index: 3, kind: input, shape index: {}]   ;;  %s721_s4 = inlined_call_operand.hbm [shape: f32[8,128], index: 4, kind: output, shape index: {}]  }
   0x1   :  { %s473_s17 = scalar_lea.hbm %s717_s0, 16 }
   0x2   :  { %p474_p0 = scmp.ne.s32.totalorder %s717_s0, %s473_s17  ;;  %p477_p1 = scmp.lt.u32.totalorder %s473_s17, %s717_s0 }
   0x4   :  { %p479_p2 = pnand %p477_p1, %p474_p0 }
   0x6   :  { %482 = shalt.err (!%p479_p2)  }
   0x7   :  { %s601_s22 = smov [#allocation5]  }
   0x8   :  { %10 = dma.hbm_to_smem %s717_s0, 16, %s601_s22, [#allocation4] }
   0x9   :  { %583 = dma.done.wait [#allocation4], 16 }
   0xa   :  { %584 = vsyncadd [#allocation4], 4294967280 }
   0xb   :  { %12 = sfence }
   0xc   :  { %13 = vsyncpa [#allocation7], 0 }
   0xd   :  { %14 = vsyncpa [#allocation8], 0  ;;  %s602_s25 = smov [#allocation6]   ;;  %s483_s29 = scalar_lea.hbm %s719_s2, 1024 }
   0xe   :  { %s20_s26 = sshll.u32 %s602_s25, 4  ;;  %p484_p3 = scmp.ne.s32.totalorder %s719_s2, %s483_s29  ;;  %s21_s26 = int_to_ptr.vmem [resolvable:$true] %s20_s26 }
   0xf   :  { %p487_p4 = scmp.lt.u32.totalorder %s483_s29, %s719_s2 }
  0x11   :  { %p489_p5 = pnand %p487_p4, %p484_p3 }
  0x13   :  { %492 = shalt.err (!%p489_p5)
}
  0x14   :  { %s493_s0 = scalar_lea.vmem %s21_s26, 1024  ;;  %p498_p7 = scmp.lt.s32.totalorder %s21_s26, %s21_s26 }
  0x15   :  { %p494_p6 = scmp.ne.s32.totalorder %s21_s26, %s493_s0  ;;  %p499_p8 = scmp.lt.s32.totalorder %s493_s0, %s493_s0 }
  0x17   :  { %p500_p9 = por %p499_p8, %p498_p7 }
  0x19   :  { %p501_p10 = pnand %p500_p9, %p494_p6 }
  0x1b   :  { %504 = shalt.err (!%p501_p10)
}
  0x1c   :  { %s603_s8 = smov 64   ;;  %s604_s9 = smov 4  }
  0x1d   :  { %26 = dma.hbm_to_vmem [thread:$0]  %s719_s2, 1024, %s21_s26, [#allocation7], %s603_s8, %s603_s8, %s604_s9  }
  0x1e   :  { %585 = dma.done.wait [#allocation7], 1024  }
  0x1f   :  { %586 = vsyncadd [#allocation7], 4294966272  ;;  %s658_s12 = smov 0  }
  0x20 LB: > { %s41_s13 = sld [smem:[#allocation5 + %s595_s12]]  ;;  %p42_p11 = scmp.lt.s32.totalorder %s595_s12, 0  ;;  %s595_s12 = sphi %s658_s12, %s39_s12  }
  0x21   : > { %s43_s14 = ssub.s32 0, %s595_s12  ;;  %s56_s2 = scalar_lea.vmem [#allocation2], %s595_s12 }
  0x22   : > { %s380_s15 = smin.u32 %s595_s12, %s43_s14  ;;  %s65_s16 = sshll.u32 %s56_s2, 4  ;;  %s668_s16 = int_to_ptr.vmem [resolvable:$true] %s65_s16 }
  0x23   : > { %s45_s17 = sand.u32 7, %s380_s15   ;;  %s70_s19 = sadd.s32 8, %s595_s12 }
  0x24   : > { %s46_s18 = ssub.s32 0, %s45_s17  ;;  %s671_s21 = sld [smem:[#allocation5 + %s70_s19]] }
  0x25   : > { %s723_s18 = smov (!%p42_p11, %s46_s18), %s45_s17  ;;  %s364_s26 = scalar_lea.vmem %s56_s2, 8 [#allocation2] }
  0x26   : > { %s383_s20 = sshll.u32 %s41_s13, 4  ;;  %p382_p12 = scmp.lt.s32.totalorder %s723_s18, 0 }
  0x27   : > { %s52_s22 = sadd.s32 8, %s723_s18  ;;  %s55_s25 = scalar_lea.hbm %s718_s1, %s383_s20 }
  0x28   : > { %s725_s22 = smov (!%p382_p12, %s52_s22), %s723_s18  ;;  %s85_s27 = sshll.u32 %s364_s26, 4  ;;  %s676_s27 = int_to_ptr.vmem [resolvable:$true] %s85_s27 }
  0x29   : > { %s57_s28 = scalar_lea.sflag [#allocation3], %s725_s22  ;;  %s505_s29 = scalar_lea.hbm %s55_s25, 16 }
  0x2a   : > { %p506_p13 = scmp.ne.s32.totalorder %s55_s25, %s505_s29  ;;  %s507_s6 = scalar_lea.hbm %s718_s1, 1024 }
  0x2b   : > { %p508_p0 = scmp.lt.u32.totalorder %s55_s25, %s718_s1  ;;  %p509_p1 = scmp.lt.u32.totalorder %s507_s6, %s505_s29 }
  0x2c   : > { %p511_p3 = scmp.lt.u32.totalorder %s505_s29, %s55_s25 }
  0x2d   : > { %p510_p2 = por %p509_p1, %p508_p0 }
  0x2f   : > { %p512_p4 = por %p511_p3, %p510_p2 }
  0x31   : > { %p513_p5 = pnand %p512_p4, %p506_p13 }
  0x33   : > { %516 = shalt.err (!%p513_p5)  }
  0x34   : > { %s517_s8 = scalar_lea.vmem %s668_s16, 16  ;;  %s605_s9 = smov [#allocation2]  }
  0x35   : > { %p518_p6 = scmp.ne.s32.totalorder %s668_s16, %s517_s8  ;;  %s519_s10 = sshll.u32 %s605_s9, 4  ;;  %s520_s10 = int_to_ptr.vmem [resolvable:$false] %s519_s10 }
  0x36   : > { %s521_s11 = scalar_lea.vmem %s520_s10, 256  ;;  %p522_p7 = scmp.lt.s32.totalorder %s668_s16, %s520_s10 }
  0x37   : > { %p523_p8 = scmp.lt.s32.totalorder %s521_s11, %s517_s8 }
  0x39   : > { %p524_p9 = por %p523_p8, %p522_p7 }
  0x3b   : > { %p525_p10 = pnand %p524_p9, %p518_p6 }
  0x3d   : > { %528 = shalt.err (!%p525_p10)  }
  0x3e   : > { %68 = dma.hbm_to_vmem [thread:$0]  %s55_s25, 16, %s668_s16, %s57_s28 }
  0x3f   : > { %s366_s13 = scalar_lea.sflag %s57_s28, 8 [#allocation3]  ;;  %s384_s14 = sshll.u32 %s671_s21, 4 }
  0x40   : > { %s73_s17 = scalar_lea.hbm %s718_s1, %s384_s14 }
  0x41   : > { %s529_s18 = scalar_lea.hbm %s73_s17, 16  ;;  %p532_p12 = scmp.lt.u32.totalorder %s73_s17, %s718_s1 }
  0x42   : > { %p530_p11 = scmp.ne.s32.totalorder %s73_s17, %s529_s18  ;;  %p533_p13 = scmp.lt.u32.totalorder %s507_s6, %s529_s18 }
  0x43   : > { %p535_p1 = scmp.lt.u32.totalorder %s529_s18, %s73_s17 }
  0x44   : > { %p534_p0 = por %p533_p13, %p532_p12 }
  0x46   : > { %p536_p2 = por %p535_p1, %p534_p0 }
  0x48   : > { %p537_p3 = pnand %p536_p2, %p530_p11 }
  0x4a   : > { %540 = shalt.err (!%p537_p3)  }
  0x4b   : > { %s541_s16 = scalar_lea.vmem %s676_s27, 16  ;;  %p546_p5 = scmp.lt.s32.totalorder %s676_s27, %s520_s10 }
  0x4c   : > { %p542_p4 = scmp.ne.s32.totalorder %s676_s27, %s541_s16  ;;  %p547_p6 = scmp.lt.s32.totalorder %s521_s11, %s541_s16 }
  0x4e   : > { %p548_p7 = por %p547_p6, %p546_p5 }
  0x50   : > { %p549_p8 = pnand %p548_p7, %p542_p4 }
  0x52   : > { %552 = shalt.err (!%p549_p8)  }
  0x53   : > { %88 = dma.hbm_to_vmem [thread:$0]  %s73_s17, 16, %s676_s27, %s366_s13 }
  0x54   : > { %s39_s12 = sadd.s32 1, %s595_s12  }
  0x55   : > { %p36_p9 = scmp.ge.s32.totalorder %s39_s12, 8  }
  0x56   :  { %s597_s21 = smov (%p36_p9), 0  }
  0x57   :  { %38 = sbr.rel (!%p36_p9) target bundleno = 32 (0x20), region = 78 }
  0x5e LB: > { %p95_p10 = scmp.lt.s32.totalorder %s599_s21, 0  ;;  %s96_s22 = ssub.s32 0, %s599_s21  ;;  %s599_s21 = sphi %s597_s21, %s94_s21  }
  0x5f   : > { %s385_s23 = smin.u32 %s599_s21, %s96_s22 }
  0x60   : > { %s98_s24 = sand.u32 7, %s385_s23  }
  0x61   : > { %s99_s25 = ssub.s32 0, %s98_s24 }
  0x62   : > { %s727_s25 = smov (!%p95_p10, %s99_s25), %s98_s24 }
  0x63   : > { %p387_p11 = scmp.lt.s32.totalorder %s727_s25, 0  ;;  %s105_s26 = sadd.s32 8, %s727_s25 }
  0x65   : > { %s729_s26 = smov (!%p387_p11, %s105_s26), %s727_s25 }
  0x66   : > { %s107_s27 = scalar_lea.sflag [#allocation3], %s729_s26 }
  0x67   : > { %587 = dma.done.wait %s107_s27, 16 }
  0x68   : > { %588 = vsyncadd %s107_s27, 4294967280  ;;  %s369_s28 = scalar_lea.sflag %s107_s27, 8 [#allocation3] }
  0x69   : > { %589 = dma.done.wait %s369_s28, 16 }
  0x6a   : > { %590 = vsyncadd %s369_s28, 4294967280  ;;  %s94_s21 = sadd.s32 1, %s599_s21  }
  0x6b   : > { %p91_p12 = scmp.ge.s32.totalorder %s94_s21, 8  }
  0x6c   :  { %v465_v0 = vld [vmem:[#allocation6] sm:$0xff] (%p91_p12)   ;;  %v606_v1 = vmov (%p91_p12), 0.0   ;;  %v466_v2 = vld [vmem:[#allocation6 + $0x8] sm:$0xff] (%p91_p12)   ;;  %vm607_vm0 = vmmov (%p91_p12), 0   ;;  %v467_v3 = vld [vmem:[#allocation6 + $0x10] sm:$0xff] (%p91_p12)   ;;  %s608_s29 = smov (%p91_p12), [#allocation9]  }
  0x6d   :  { %93 = sbr.rel (!%p91_p12) target bundleno = 94 (0x5e), region = 89  ;;  %422 = vmatprep.subr.bf16.mxu0 (%p91_p12), %v606_v1  ;;  %438 = vmatprep.mubr.msk.bf16.mxu0 (%p91_p12), %vm607_vm0, %v606_v1  ;;  %v468_v4 = vld [vmem:[#allocation6 + $0x18] sm:$0xff] (%p91_p12)   ;;  %v469_v5 = vld [vmem:[#allocation6 + $0x20] sm:$0xff] (%p91_p12)   ;;  %v470_v6 = vld [vmem:[#allocation6 + $0x28] sm:$0xff] (%p91_p12)   ;;  %s237_s30 = sshll.u32 (%p91_p12), %s608_s29, 4  ;;  %s238_s30 = int_to_ptr.vmem [resolvable:$true] %s237_s30 }
  0x6e   :  { %423 = vmatpush3.bf16.msra.mxu0 (%p91_p12), %v465_v0  ;;  %v471_v7 = vld [vmem:[#allocation6 + $0x30] sm:$0xff] (%p91_p12)   ;;  %v116_v9 = vld [vmem:[#allocation2 + $0x8] sm:$0xff] (%p91_p12)  ;;  %s553_s5 = scalar_lea.vmem (%p91_p12), %s238_s30, 128  ;;  %p558_p0 = scmp.lt.s32.totalorder (%p91_p12), %s238_s30, %s238_s30 }
  0x6f   :  { %424 = vmatprep.subr.bf16.mxu0 (%p91_p12), %v606_v1  ;;  %v114_v8 = vld [vmem:[#allocation2] sm:$0xff] (%p91_p12)  ;;  %v472_v11 = vld [vmem:[#allocation6 + $0x38] sm:$0xff] (%p91_p12)   ;;  %p554_p13 = scmp.ne.s32.totalorder (%p91_p12), %s238_s30, %s553_s5  ;;  %p559_p1 = scmp.lt.s32.totalorder (%p91_p12), %s553_s5, %s553_s5 }
  0x70   :  { %v117_v10 = vadd.f32 (%p91_p12), %v116_v9, %v114_v8  ;;  %v388_v13 = vld [vmem:[%s720_s3] ss:$0 sm:$0xff] (%p91_p12) }
  0x71   :  { %p560_p2 = por (%p91_p12), %p559_p1, %p558_p0 }
  0x72   :  { %425 = vmatpush3.bf16.msra.mxu0 (%p91_p12), %v466_v2  ;;  %v118_v12 = vpack.c.bf16 (%p91_p12), %v117_v10, %v117_v10 }
  0x73   :  { %426 = vmatprep.subr.bf16.mxu0 (%p91_p12), %v606_v1  ;;  %p561_p3 = pnand (%p91_p12), %p560_p2, %p554_p13 }
  0x76   :  { %427 = vmatpush3.bf16.msra.mxu0 %v467_v3 }
  0x77   :  { %428 = vmatprep.subr.bf16.mxu0 %v606_v1 }
  0x7a   :  { %429 = vmatpush3.bf16.msra.mxu0 %v468_v4 }
  0x7b   :  { %430 = vmatprep.subr.bf16.mxu0 %v606_v1 }
  0x7e   :  { %431 = vmatpush3.bf16.msra.mxu0 %v469_v5 }
  0x7f   :  { %432 = vmatprep.subr.bf16.mxu0 %v606_v1 }
  0x82   :  { %433 = vmatpush3.bf16.msra.mxu0 %v470_v6 }
  0x83   :  { %434 = vmatprep.subr.bf16.mxu0 %v606_v1 }
  0x86   :  { %435 = vmatpush3.bf16.msra.mxu0 %v471_v7 }
  0x87   :  { %436 = vmatprep.subr.bf16.mxu0 %v606_v1 }
  0x8a   :  { %437 = vmatpush3.bf16.msra.mxu0 %v472_v11 }
  0x8d   :  { %439 = vmatmul.mubr.bf16.vlgmr.msra.gmra.mrb[0].mxu0 %v118_v12 }
 0x160   :  { %v224_v14 = vpop.f32.mrb[0].mxu0 }
 0x161   :  { %v225_v15 = vadd.f32 %v388_v13, %v224_v14  ;;  %v440_v16 = vpop.f32.mrb[1].mxu0 }
 0x162   :  { %v227_v17 = vpop.f32.mrb[2].mxu0 }
 0x163   :  { %230 = vst [vmem:[#allocation9] sm:$0xff] %v225_v15  ;;  %v441_v18 = vpop.f32.mrb[3].mxu0 }
 0x164   :  { %564 = shalt.err (!%p561_p3)
}
 0x165   :  { %s565_s3 = scalar_lea.hbm %s721_s4, 128 }
 0x166   :  { %p566_p4 = scmp.ne.s32.totalorder %s721_s4, %s565_s3  ;;  %p569_p5 = scmp.lt.u32.totalorder %s565_s3, %s721_s4 }
 0x168   :  { %p571_p6 = pnand %p569_p5, %p566_p4 }
 0x16a   :  { %574 = shalt.err (!%p571_p6)
}
 0x16b   :  { %240 = dma.vmem_to_hbm [thread:$0]  %s238_s30, 128, %s721_s4, [#allocation8]  }
 0x16c   :  { %591 = dma.done.wait [#allocation8], 128  }
 0x16d   :  { %592 = vsyncadd [#allocation8], 4294967168 }
 0x16e   :  { %244 = vsyncpa [#allocation7], 1 }
 0x16f   :  { %245 = vsyncpa [#allocation8], 1 }
 0x170   :  { %246 = vsyncmov [#allocation3] }
 0x173   :  { %s247_s14 = vpop.sfrf %246 }
 0x174   :  { %p397_p7 = scmp.ne.s32.totalorder %s247_s14, 0 }
 0x176   :  { %251 = shalt.err (%p397_p7)  }
 0x177   :  { %253 = vsyncmov [#allocation3 + $0x1] }
 0x17a   :  { %s254_s15 = vpop.sfrf %253 }
 0x17b   :  { %p398_p8 = scmp.ne.s32.totalorder %s254_s15, 0 }
 0x17d   :  { %258 = shalt.err (%p398_p8)  }
 0x17e   :  { %260 = vsyncmov [#allocation3 + $0x2] }
 0x181   :  { %s261_s2 = vpop.sfrf %260 }
 0x182   :  { %p399_p9 = scmp.ne.s32.totalorder %s261_s2, 0 }
 0x184   :  { %265 = shalt.err (%p399_p9)  }
 0x185   :  { %267 = vsyncmov [#allocation3 + $0x3] }
 0x188   :  { %s268_s17 = vpop.sfrf %267 }
 0x189   :  { %p400_p10 = scmp.ne.s32.totalorder %s268_s17, 0 }
 0x18b   :  { %272 = shalt.err (%p400_p10)  }
 0x18c   :  { %274 = vsyncmov [#allocation3 + $0x4] }
 0x18f   :  { %s275_s4 = vpop.sfrf %274 }
 0x190   :  { %p401_p11 = scmp.ne.s32.totalorder %s275_s4, 0 }
 0x192   :  { %279 = shalt.err (%p401_p11)  }
 0x193   :  { %281 = vsyncmov [#allocation3 + $0x5] }
 0x196   :  { %s282_s18 = vpop.sfrf %281 }
 0x197   :  { %p402_p12 = scmp.ne.s32.totalorder %s282_s18, 0 }
 0x199   :  { %286 = shalt.err (%p402_p12)  }
 0x19a   :  { %288 = vsyncmov [#allocation3 + $0x6] }
 0x19d   :  { %s289_s19 = vpop.sfrf %288 }
 0x19e   :  { %p403_p13 = scmp.ne.s32.totalorder %s289_s19, 0 }
 0x1a0   :  { %293 = shalt.err (%p403_p13)  }
 0x1a1   :  { %295 = vsyncmov [#allocation3 + $0x7] }
 0x1a4   :  { %s296_s20 = vpop.sfrf %295 }
 0x1a5   :  { %p404_p0 = scmp.ne.s32.totalorder %s296_s20, 0 }
 0x1a7   :  { %300 = shalt.err (%p404_p0)  }
 0x1a8   :  { %302 = vsyncmov [#allocation3 + $0x8] }
 0x1ab   :  { %s303_s16 = vpop.sfrf %302 }
 0x1ac   :  { %p405_p1 = scmp.ne.s32.totalorder %s303_s16, 0 }
 0x1ae   :  { %307 = shalt.err (%p405_p1)  }
 0x1af   :  { %309 = vsyncmov [#allocation3 + $0x9] }
 0x1b2   :  { %s310_s21 = vpop.sfrf %309 }
 0x1b3   :  { %p406_p2 = scmp.ne.s32.totalorder %s310_s21, 0 }
 0x1b5   :  { %314 = shalt.err (%p406_p2)  }
 0x1b6   :  { %316 = vsyncmov [#allocation3 + $0xa] }
 0x1b9   :  { %s317_s22 = vpop.sfrf %316 }
 0x1ba   :  { %p407_p3 = scmp.ne.s32.totalorder %s317_s22, 0 }
 0x1bc   :  { %321 = shalt.err (%p407_p3)  }
 0x1bd   :  { %323 = vsyncmov [#allocation3 + $0xb] }
 0x1c0   :  { %s324_s23 = vpop.sfrf %323 }
 0x1c1   :  { %p408_p4 = scmp.ne.s32.totalorder %s324_s23, 0 }
 0x1c3   :  { %328 = shalt.err (%p408_p4)  }
 0x1c4   :  { %330 = vsyncmov [#allocation3 + $0xc] }
 0x1c7   :  { %s331_s24 = vpop.sfrf %330 }
 0x1c8   :  { %p409_p5 = scmp.ne.s32.totalorder %s331_s24, 0 }
 0x1ca   :  { %335 = shalt.err (%p409_p5)  }
 0x1cb   :  { %337 = vsyncmov [#allocation3 + $0xd] }
 0x1ce   :  { %s338_s25 = vpop.sfrf %337 }
 0x1cf   :  { %p410_p6 = scmp.ne.s32.totalorder %s338_s25, 0 }
 0x1d1   :  { %342 = shalt.err (%p410_p6)  }
 0x1d2   :  { %344 = vsyncmov [#allocation3 + $0xe] }
 0x1d5   :  { %s345_s26 = vpop.sfrf %344 }
 0x1d6   :  { %p411_p7 = scmp.ne.s32.totalorder %s345_s26, 0 }
 0x1d8   :  { %349 = shalt.err (%p411_p7)  }
 0x1d9   :  { %351 = vsyncmov [#allocation3 + $0xf] }
 0x1dc   :  { %s352_s27 = vpop.sfrf %351 }
 0x1dd   :  { %p412_p8 = scmp.ne.s32.totalorder %s352_s27, 0 }
 0x1df   :  { %356 = shalt.err (%p412_p8)  }

</bundles_post_ra>
